<compile_context>
chip_gen: v5e
topology: v5e:2x2
jax: 0.10.0
libtpu: 0.0.40
codegen_flags: <defaults>
</compile_context>

<pallas_src>
import functools

import jax
import jax.numpy as jnp
from jax import lax
from jax.experimental import pallas as pl
from jax.experimental.pallas import tpu as pltpu


def _cdiv(a, b):
    return -(-a // b)


def _round_up(x, m):
    return ((x + m - 1) // m) * m


# --------------------------------------------------------------------------- #
# Kernel
# --------------------------------------------------------------------------- #
def _mean_agg_kernel(x_ref, o_ref, *scratch, inv_s, s_rem):
    # x_ref:   (TB, TS, TF) VMEM input tile
    # o_ref:   (TB, TF)     VMEM output tile, resident across the S grid axis
    # scratch: optional (TB, TF) f32 accumulator (only for non-f32 outputs)
    acc_ref = scratch[0] if scratch else o_ref
    si = pl.program_id(2)
    n_s = pl.num_programs(2)

    @pl.when(si == 0)
    def _():
        acc_ref[...] = jnp.zeros_like(acc_ref)

    x = x_ref[...]
    if s_rem:
        # Last S tile is ragged: rows >= s_rem are out-of-bounds and MUST be
        # masked (they would otherwise feed valid outputs).  Ragged B/F tails
        # need no mask: they only feed output rows/lanes dropped on writeback.
        ts = x.shape[1]
        limit = jnp.where(si == n_s - 1, s_rem, ts)
        row = lax.broadcasted_iota(jnp.int32, (1, ts, 1), 1)
        x = jnp.where(row < limit, x, jnp.zeros((), x.dtype))

    # Upcast fused into the reduction: no f32 copy of the (TB, TS, TF) tile.
    acc_ref[...] += jnp.sum(x, axis=1, dtype=jnp.float32)

    @pl.when(si == n_s - 1)
    def _():
        o_ref[...] = (acc_ref[...] * inv_s).astype(o_ref.dtype)


# --------------------------------------------------------------------------- #
# Wrapper
# --------------------------------------------------------------------------- #
def _vmem_capacity_bytes():
    try:
        info = pltpu.get_tpu_info()
        cap = getattr(info, "vmem_capacity_bytes", None)
        if cap:
            return int(cap)
    except Exception:
        pass
    return 64 << 20  # conservative (v7x-sized) default


def _footprint(TB, TS, TF, itemsize, n_in_buf, need_acc):
    in_b = TB * TS * TF * itemsize
    out_b = TB * TF * itemsize
    acc_b = TB * TF * 4 if need_acc else 0
    return n_in_buf * in_b + 2 * out_b + acc_b


def mean_agg(x):
    """x: (B, S, C, H, W) array -> (B, C, H, W), mean over axis 1."""
    B, S, C, H, W = x.shape
    F = C * H * W

    if not jnp.issubdtype(x.dtype, jnp.floating):
        x = x.astype(jnp.float32)  # mean of non-float promotes to float

    itemsize = jnp.dtype(x.dtype).itemsize
    x_flat = x.reshape(B, S, F)
    need_acc = x.dtype != jnp.float32  # f32 accumulates directly into o_ref

    # ---- generation-gated budgets -----------------------------------------
    vmem_cap = _vmem_capacity_bytes()
    is_small_vmem = vmem_cap < (100 << 20)          # v7x-like (64 MiB / TC)
    target_tile_bytes = (8 << 20) if is_small_vmem else (16 << 20)
    lane_cap = 4096 if is_small_vmem else 8192
    vmem_ceiling = (48 << 20) if is_small_vmem else (96 << 20)
    headroom = 4 << 20
    n_in_buf = 3 if is_small_vmem else 2            # budget for Buffered(3)

    # ---- tile selection (no padding anywhere) ------------------------------
    # Lane (F) tile: full extent when it fits (exempt from the 128 rule),
    # otherwise a 128-multiple cap with a ragged last tile (OOB lanes dropped).
    TF = F if F <= lane_cap else lane_cap

    row_bytes = TF * itemsize
    min_tb = B if B <= 8 else 8

    # S tile: keep the whole reduction axis resident when it fits; otherwise
    # stream it in multiples of 8 (ragged tail masked inside the kernel).
    if S <= 8 or min_tb * S * row_bytes <= target_tile_bytes:
        TS = S
    else:
        ts = max(8, target_tile_bytes // (min_tb * row_bytes))
        TS = max(8, (ts // 8) * 8)

    # B tile: whole B, or a multiple of 8 (ragged tail writes are dropped).
    if B <= 8:
        TB = B
    else:
        tb = max(8, target_tile_bytes // (TS * row_bytes))
        tb = max(8, (tb // 8) * 8)
        TB = B if B <= tb else tb

    # Safety: shrink until the multi-buffered footprint fits the VMEM budget.
    while _footprint(TB, TS, TF, itemsize, n_in_buf, need_acc) + headroom > vmem_ceiling:
        if TS > 8:
            TS = max(8, ((TS // 2) // 8) * 8)
        elif TB > 8:
            TB = max(8, ((TB // 2) // 8) * 8)
        else:
            break

    # v7x: make sure the two "parallel" axes expose >= 2 blocks so both
    # TensorCores share the work (no effect on correctness elsewhere).
    total_bytes = B * S * F * itemsize
    if is_small_vmem and total_bytes >= (4 << 20):
        if _cdiv(B, TB) * _cdiv(F, TF) < 2:
            if B > 8:
                TB = max(8, _round_up(_cdiv(B, 2), 8))
            elif F >= 256:
                TF = _round_up(_cdiv(F, 2), 128)

    grid = (_cdiv(B, TB), _cdiv(F, TF), _cdiv(S, TS))
    s_rem = S % TS

    # Honest VMEM limit: actual footprint + headroom, capped below physical.
    need = _footprint(TB, TS, TF, itemsize, n_in_buf, need_acc) + headroom
    vmem_limit = int(min(max(need, 16 << 20), vmem_ceiling))

    # Deeper input buffering when streaming S on small-VMEM parts.
    in_spec_kwargs = {}
    if is_small_vmem and grid[2] >= 2:
        in_spec_kwargs["pipeline_mode"] = pl.Buffered(3)

    in_spec = pl.BlockSpec((TB, TS, TF), lambda bi, fi, si: (bi, si, fi),
                           **in_spec_kwargs)
    out_spec = pl.BlockSpec((TB, TF), lambda bi, fi, si: (bi, fi))
    scratch_shapes = [] if not need_acc else [pltpu.VMEM((TB, TF), jnp.float32)]

    kernel = functools.partial(_mean_agg_kernel, inv_s=1.0 / S, s_rem=s_rem)

    out = pl.pallas_call(
        kernel,
        out_shape=jax.ShapeDtypeStruct((B, F), x.dtype),
        grid_spec=pltpu.PrefetchScalarGridSpec(
            num_scalar_prefetch=0,
            grid=grid,
            in_specs=[in_spec],
            out_specs=out_spec,
            scratch_shapes=scratch_shapes,
        ),
        compiler_params=pltpu.CompilerParams(
            dimension_semantics=("parallel", "parallel", "arbitrary"),
            vmem_limit_bytes=vmem_limit,
        ),
    )(x_flat)

    return out.reshape(B, C, H, W)


if __name__ == "__main__":
    key = jax.random.PRNGKey(0)
    B, S, C, H, W = 2, 8, 4, 16, 16
    x = jax.random.normal(key, (B, S, C, H, W), dtype=jnp.float32)

    y = mean_agg(x)
    y = jax.block_until_ready(y)

    # correctness check against plain-JAX reference
    ref = jnp.mean(x, axis=1)
    assert y.shape == (B, C, H, W)
    assert jnp.allclose(y, ref, atol=1e-5, rtol=1e-5)

    print("KERNEL_OK")
</pallas_src>

<mosaic_0001>
module attributes {stable_mosaic.version = 11 : i64} {
  func.func @_mean_agg_kernel(%arg0: i32, %arg1: i32, %arg2: i32, %arg3: memref<2x8x1024xf32, #tpu.memory_space<vmem>>, %arg4: memref<2x1024xf32, #tpu.memory_space<vmem>>) attributes {dimension_semantics = [#tpu.dimension_semantics<parallel>, #tpu.dimension_semantics<parallel>, #tpu.dimension_semantics<arbitrary>], iteration_bounds = array<i64: 1, 1, 1>, scalar_prefetch = 0 : i64, scratch_operands = 0 : i64, tpu.core_type = #tpu.core_type<tc>, window_params = [{transform_indices = @transform_0, window_bounds = array<i64: 2, 8, 1024>}, {transform_indices = @transform_1, window_bounds = array<i64: 2, 1024>}]} {
    %c0_i32 = arith.constant 0 : i32
    %0 = arith.cmpi eq, %arg2, %c0_i32 : i32
    %1 = arith.extui %0 : i1 to i32
    %c0_i32_0 = arith.constant 0 : i32
    %2 = arith.cmpi ne, %1, %c0_i32_0 : i32
    scf.if %2 {
      %cst_9 = arith.constant 0.000000e+00 : f32
      %11 = vector.broadcast %cst_9 : f32 to vector<2x1024xf32>
      %c0_10 = arith.constant 0 : index
      %c0_11 = arith.constant 0 : index
      %12 = vector.load %arg4[%c0_10, %c0_11] : memref<2x1024xf32, #tpu.memory_space<vmem>>, vector<2x1024xf32>
      tpu.vector_store %arg4[%c0_10, %c0_11], %11 {strides = array<i32>} : memref<2x1024xf32, #tpu.memory_space<vmem>>, vector<2x1024xf32>,
    } else {
    }
    %c0 = arith.constant 0 : index
    %c0_1 = arith.constant 0 : index
    %c0_2 = arith.constant 0 : index
    %3 = vector.load %arg3[%c0, %c0_1, %c0_2] : memref<2x8x1024xf32, #tpu.memory_space<vmem>>, vector<2x8x1024xf32>
    %c0_3 = arith.constant 0 : index
    %c0_4 = arith.constant 0 : index
    %4 = vector.load %arg4[%c0_3, %c0_4] : memref<2x1024xf32, #tpu.memory_space<vmem>>, vector<2x1024xf32>
    %cst = arith.constant dense<0.000000e+00> : vector<2x1024xf32>
    %5 = vector.multi_reduction <add>, %3, %cst [1] : vector<2x8x1024xf32> to vector<2x1024xf32>
    %6 = arith.addf %4, %5 : vector<2x1024xf32>
    %c0_5 = arith.constant 0 : index
    %c0_6 = arith.constant 0 : index
    %7 = vector.load %arg4[%c0_5, %c0_6] : memref<2x1024xf32, #tpu.memory_space<vmem>>, vector<2x1024xf32>
    tpu.vector_store %arg4[%c0_5, %c0_6], %6 {strides = array<i32>} : memref<2x1024xf32, #tpu.memory_space<vmem>>, vector<2x1024xf32>,
    %c0_i32_7 = arith.constant 0 : i32
    %8 = arith.cmpi eq, %arg2, %c0_i32_7 : i32
    %9 = arith.extui %8 : i1 to i32
    %c0_i32_8 = arith.constant 0 : i32
    %10 = arith.cmpi ne, %9, %c0_i32_8 : i32
    scf.if %10 {
      %c0_9 = arith.constant 0 : index
      %c0_10 = arith.constant 0 : index
      %11 = vector.load %arg4[%c0_9, %c0_10] : memref<2x1024xf32, #tpu.memory_space<vmem>>, vector<2x1024xf32>
      %cst_11 = arith.constant 1.250000e-01 : f32
      %12 = vector.broadcast %cst_11 : f32 to vector<2x1024xf32>
      %13 = arith.mulf %11, %12 : vector<2x1024xf32>
      %c0_12 = arith.constant 0 : index
      %c0_13 = arith.constant 0 : index
      %14 = vector.load %arg4[%c0_12, %c0_13] : memref<2x1024xf32, #tpu.memory_space<vmem>>, vector<2x1024xf32>
      tpu.vector_store %arg4[%c0_12, %c0_13], %13 {strides = array<i32>} : memref<2x1024xf32, #tpu.memory_space<vmem>>, vector<2x1024xf32>,
    } else {
    }
    return
  }
  func.func @transform_0(%arg0: i32, %arg1: i32, %arg2: i32) -> (i32, i32, i32) {
    %c0_i32 = arith.constant 0 : i32
    return %arg0, %arg2, %arg1 : i32, i32, i32
  }
  func.func @transform_1(%arg0: i32, %arg1: i32, %arg2: i32) -> (i32, i32) {
    %c0_i32 = arith.constant 0 : i32
    return %arg0, %arg1 : i32, i32
  }
}

</mosaic_0001>

<bundles_post_ra>
// kernel: tpu_custom_call.1
= control target key start
LH: loop header
LB: loop body
LE: loop exit
PB: predicated region body
PF: predicated region fallthrough
CT: control target
= control target key end

     0   :  { %6 = vsyncpa [#allocation3], 0  ;;  %s337_s0 = inlined_call_operand.hbm [shape: f32[2,8,1024], index: 0, kind: input, shape index: {}]   ;;  %s338_s1 = inlined_call_operand.hbm [shape: f32[2,1024], index: 1, kind: output, shape index: {}]  }
   0x1   :  { %7 = vsyncpa [#allocation4], 0  ;;  %s12_s8 = sshll.u32 %s337_s0, 4  ;;  %s297_s9 = smov [#allocation2]   ;;  %s13_s8 = int_to_ptr.hbm [resolvable:$true] %s12_s8 }
   0x2   :  { %s14_s10 = sshll.u32 %s297_s9, 4  ;;  %s298_s11 = smov 1024   ;;  %s15_s10 = int_to_ptr.vmem [resolvable:$true] %s14_s10 }
   0x3   :  { %s299_s12 = smov 64  }
   0x4   :  { %20 = dma.hbm_to_vmem [thread:$0]  %s13_s8, 2048, %s15_s10, [#allocation3], %s298_s11, %s298_s11, %s299_s12  }
   0x5   :  { %293 = dma.done.wait [#allocation3], 2048  }
   0x6   :  { %294 = vsyncadd [#allocation3], 4294965248  ;;  %v31_v0 = vld [vmem:[#allocation2] sm:$0xff]  ;;  %v32_v1 = vld [vmem:[#allocation2 + $0x8] sm:$0xff]  ;;  %vm173_vm0 = vcmask 1041408   ;;  %vm175_vm1 = vcmask 1045508  }
   0x7   :  { %v33_v2 = vld [vmem:[#allocation2 + $0x10] sm:$0xff]  ;;  %v34_v3 = vld [vmem:[#allocation2 + $0x18] sm:$0xff]  ;;  %v39_v4 = vld [vmem:[#allocation2 + $0x40] sm:$0xff]  ;;  %v49_v6 = vrot.slane %v31_v0, 4  ;;  %v55_v7 = vrot.slane %v32_v1, 4  ;;  %vm177_vm2 = vcmask 1043456  }
   0x8   :  { %v40_v5 = vld [vmem:[#allocation2 + $0x48] sm:$0xff]  ;;  %v61_v8 = vrot.slane %v33_v2, 4  ;;  %v41_v9 = vld [vmem:[#allocation2 + $0x50] sm:$0xff]  ;;  %v42_v10 = vld [vmem:[#allocation2 + $0x58] sm:$0xff]  ;;  %v67_v11 = vrot.slane %v34_v3, 4  ;;  %v97_v12 = vrot.slane %v39_v4, 4 }
   0x9   :  { %v103_v13 = vrot.slane %v40_v5, 4  ;;  %v50_v14 = vadd.f32 %v49_v6, %v31_v0  ;;  %v56_v15 = vadd.f32 %v55_v7, %v32_v1  ;;  %v109_v17 = vrot.slane %v41_v9, 4  ;;  %v35_v46 = vld [vmem:[#allocation2 + $0x20] sm:$0xff]  ;;  %v36_v51 = vld [vmem:[#allocation2 + $0x28] sm:$0xff]  ;;  %v37_v56 = vld [vmem:[#allocation2 + $0x30] sm:$0xff]  ;;  %s300_s0 = smov [#allocation5]  }
   0xa   :  { %v62_v16 = vadd.f32 %v61_v8, %v33_v2  ;;  %v68_v18 = vadd.f32 %v67_v11, %v34_v3  ;;  %v98_v19 = vadd.f32 %v97_v12, %v39_v4  ;;  %v115_v21 = vrot.slane %v42_v10, 4  ;;  %v38_v0 = vld [vmem:[#allocation2 + $0x38] sm:$0xff]  ;;  %v43_v4 = vld [vmem:[#allocation2 + $0x60] sm:$0xff]  ;;  %s228_s13 = sshll.u32 %s300_s0, 4  ;;  %s230_s16 = sshll.u32 %s338_s1, 4  ;;  %s229_s13 = int_to_ptr.vmem [resolvable:$true] %s228_s13  ;;  %s231_s16 = int_to_ptr.hbm [resolvable:$true] %s230_s16 }
   0xb   :  { %v104_v20 = vadd.f32 %v103_v13, %v40_v5  ;;  %v51_v22 = vrot.slane %v50_v14, 2  ;;  %v57_v23 = vrot.slane %v56_v15, 2  ;;  %v110_v25 = vadd.f32 %v109_v17, %v41_v9  ;;  %v44_v5 = vld [vmem:[#allocation2 + $0x68] sm:$0xff] }
   0xc   :  { %v63_v24 = vrot.slane %v62_v16, 2  ;;  %v69_v26 = vrot.slane %v68_v18, 2  ;;  %v99_v27 = vrot.slane %v98_v19, 2  ;;  %v116_v29 = vadd.f32 %v115_v21, %v42_v10 }
   0xd   :  { %v105_v28 = vrot.slane %v104_v20, 2  ;;  %v52_v30 = vadd.f32 %v51_v22, %v50_v14  ;;  %v58_v31 = vadd.f32 %v57_v23, %v56_v15  ;;  %v111_v33 = vrot.slane %v110_v25, 2 }
   0xe   :  { %v64_v32 = vadd.f32 %v63_v24, %v62_v16  ;;  %v70_v34 = vadd.f32 %v69_v26, %v68_v18  ;;  %v100_v35 = vadd.f32 %v99_v27, %v98_v19  ;;  %v117_v37 = vrot.slane %v116_v29, 2  ;;  %v45_v16 = vld [vmem:[#allocation2 + $0x70] sm:$0xff] }
   0xf   :  { %v106_v36 = vadd.f32 %v105_v28, %v104_v20  ;;  %v53_v38 = vrot.slane %v52_v30, 1  ;;  %v59_v39 = vrot.slane %v58_v31, 1  ;;  %v112_v41 = vadd.f32 %v111_v33, %v110_v25 }
  0x10   :  { %v65_v40 = vrot.slane %v64_v32, 1  ;;  %v71_v42 = vrot.slane %v70_v34, 1  ;;  %v101_v43 = vrot.slane %v100_v35, 1  ;;  %v118_v45 = vadd.f32 %v117_v37, %v116_v29 }
  0x11   :  { %v107_v44 = vrot.slane %v106_v36, 1  ;;  %v54_v47 = vadd.f32 %v53_v38, %v52_v30  ;;  %v60_v48 = vadd.f32 %v59_v39, %v58_v31  ;;  %v113_v50 = vrot.slane %v112_v41, 1 }
  0x12   :  { %v66_v49 = vadd.f32 %v65_v40, %v64_v32  ;;  %vm193_vm3 = vcmask 1041409   ;;  %v72_v52 = vadd.f32 %v71_v42, %v70_v34  ;;  %v102_v53 = vadd.f32 %v101_v43, %v100_v35  ;;  %v46_v35 = vld [vmem:[#allocation2 + $0x78] sm:$0xff] }
  0x13   :  { %v108_v54 = vadd.f32 %v107_v44, %v106_v36  ;;  %v119_v55 = vrot.slane %v118_v45, 1  ;;  %v114_v57 = vadd.f32 %v113_v50, %v112_v41  ;;  %v161_v58 = vrot.slane %v60_v48, 6 }
  0x14   :  { %v162_v59 = vrot.slane %v66_v49, 4  ;;  %v73_v60 = vrot.slane %v35_v46, 4  ;;  %v163_v62 = vrot.slane %v72_v52, 2  ;;  %v79_v1 = vrot.slane %v36_v51, 4 }
  0x15   :  { %v120_v61 = vadd.f32 %v119_v55, %v118_v45  ;;  %v167_v63 = vrot.slane %v108_v54, 6  ;;  %v168_v2 = vrot.slane %v114_v57, 4  ;;  %v174_v3 = vsel %vm173_vm0, %v54_v47, %v161_v58 }
  0x16   :  { %v74_v6 = vadd.f32 %v73_v60, %v35_v46  ;;  %v85_v7 = vrot.slane %v37_v56, 4  ;;  %v176_v9 = vsel %vm175_vm1, %v162_v59, %v163_v62  ;;  %v80_v11 = vadd.f32 %v79_v1, %v36_v51 }
  0x17   :  { %v169_v8 = vrot.slane %v120_v61, 2  ;;  %v182_v10 = vsel %vm173_vm0, %v102_v53, %v167_v63  ;;  %v178_v12 = vsel %vm177_vm2, %v174_v3, %v176_v9  ;;  %vm195_vm4 = vcmask 1043459  }
  0x18   :  { %v86_v13 = vadd.f32 %v85_v7, %v37_v56  ;;  %v91_v14 = vrot.slane %v38_v0, 4  ;;  %v81_v17 = vrot.slane %v80_v11, 2  ;;  %v121_v18 = vrot.slane %v43_v4, 4 }
  0x19   :  { %v183_v15 = vsel %vm175_vm1, %v168_v2, %v169_v8  ;;  %v127_v19 = vrot.slane %v44_v5, 4  ;;  %v75_v21 = vrot.slane %v74_v6, 2  ;;  %vm197_vm5 = vcmask 1045509  }
  0x1a   :  { %v184_v20 = vsel %vm177_vm2, %v182_v10, %v183_v15  ;;  %v87_v22 = vrot.slane %v86_v13, 2  ;;  %v92_v23 = vadd.f32 %v91_v14, %v38_v0  ;;  %v82_v25 = vadd.f32 %v81_v17, %v80_v11 }
  0x1b   :  { %v192_v24 = vrot.slane %v184_v20, 7  ;;  %v122_v26 = vadd.f32 %v121_v18, %v43_v4  ;;  %v128_v27 = vadd.f32 %v127_v19, %v44_v5  ;;  %v133_v30 = vrot.slane %v45_v16, 4 }
  0x1c   :  { %v88_v28 = vadd.f32 %v87_v22, %v86_v13  ;;  %v93_v29 = vrot.slane %v92_v23, 2  ;;  %vm199_vm6 = vcmask 1047559   ;;  %v76_v38 = vadd.f32 %v75_v21, %v74_v6 }
  0x1d   :  { %v194_v31 = vsel %vm193_vm3, %v192_v24, %v178_v12  ;;  %v123_v32 = vrot.slane %v122_v26, 2  ;;  %v129_v33 = vrot.slane %v128_v27, 2  ;;  %v83_v39 = vrot.slane %v82_v25, 1 }
  0x1e   :  { %v196_v34 = vsel %vm195_vm4, %v192_v24, %v194_v31  ;;  %v94_v36 = vadd.f32 %v93_v29, %v92_v23  ;;  %v89_v42 = vrot.slane %v88_v28, 1  ;;  %v134_v44 = vadd.f32 %v133_v30, %v45_v16 }
  0x1f   :  { %v198_v37 = vsel %vm197_vm5, %v192_v24, %v196_v34  ;;  %v130_v40 = vadd.f32 %v129_v33, %v128_v27  ;;  %v124_v43 = vadd.f32 %v123_v32, %v122_v26  ;;  %v139_v47 = vrot.slane %v46_v35, 4 }
  0x20   :  { %v200_v41 = vsel %vm199_vm6, %v192_v24, %v198_v37  ;;  %v95_v45 = vrot.slane %v94_v36, 1  ;;  %v135_v48 = vrot.slane %v134_v44, 2  ;;  %v77_v51 = vrot.slane %v76_v38, 1 }
  0x21   :  { %v131_v46 = vrot.slane %v130_v40, 1  ;;  %v140_v49 = vadd.f32 %v139_v47, %v46_v35  ;;  %v219_v50 = vmul.f32 0.125, %v200_v41  ;;  %v84_v52 = vadd.f32 %v83_v39, %v82_v25 }
  0x22   :  { %v90_v53 = vadd.f32 %v89_v42, %v88_v28  ;;  %v136_v54 = vadd.f32 %v135_v48, %v134_v44  ;;  %v96_v55 = vadd.f32 %v95_v45, %v94_v36  ;;  %v125_v56 = vrot.slane %v124_v43, 1 }
  0x23   :  { %v132_v57 = vadd.f32 %v131_v46, %v130_v40  ;;  %v141_v58 = vrot.slane %v140_v49, 2  ;;  %221 = vst [vmem:[#allocation5] sm:$0xff] %v219_v50  ;;  %v78_v61 = vadd.f32 %v77_v51, %v76_v38  ;;  %v164_v63 = vrot.slane %v84_v52, 6 }
  0x24   :  { %v137_v59 = vrot.slane %v136_v54, 1  ;;  %v165_v0 = vrot.slane %v90_v53, 4  ;;  %v126_v1 = vadd.f32 %v125_v56, %v124_v43  ;;  %v166_v3 = vrot.slane %v96_v55, 2 }
  0x25   :  { %v142_v60 = vadd.f32 %v141_v58, %v140_v49  ;;  %v170_v4 = vrot.slane %v132_v57, 6  ;;  %v179_v8 = vsel %vm173_vm0, %v78_v61, %v164_v63 }
  0x26   :  { %v138_v62 = vadd.f32 %v137_v59, %v136_v54  ;;  %v180_v9 = vsel %vm175_vm1, %v165_v0, %v166_v3 }
  0x27   :  { %v143_v2 = vrot.slane %v142_v60, 1  ;;  %v185_v10 = vsel %vm173_vm0, %v126_v1, %v170_v4  ;;  %v181_v12 = vsel %vm177_vm2, %v179_v8, %v180_v9 }
  0x28   :  { %v171_v6 = vrot.slane %v138_v62, 4 }
  0x29   :  { %v144_v5 = vadd.f32 %v143_v2, %v142_v60 }
  0x2b   :  { %v172_v7 = vrot.slane %v144_v5, 2 }
  0x2d   :  { %v186_v11 = vsel %vm175_vm1, %v171_v6, %v172_v7 }
  0x2e   :  { %v187_v13 = vsel %vm177_vm2, %v185_v10, %v186_v11 }
  0x2f   :  { %v203_v14 = vrot.slane %v187_v13, 7 }
  0x31   :  { %v204_v15 = vsel %vm193_vm3, %v203_v14, %v181_v12 }
  0x32   :  { %v205_v16 = vsel %vm195_vm4, %v203_v14, %v204_v15 }
  0x33   :  { %v206_v17 = vsel %vm197_vm5, %v203_v14, %v205_v16 }
  0x34   :  { %v207_v18 = vsel %vm199_vm6, %v203_v14, %v206_v17 }
  0x35   :  { %v220_v19 = vmul.f32 0.125, %v207_v18 }
  0x37   :  { %222 = vst [vmem:[#allocation5 + $0x8] sm:$0xff] %v220_v19 }
  0x38   :  { %233 = dma.vmem_to_hbm [thread:$0]  %s229_s13, 256, %s231_s16, [#allocation4]  }
  0x39   :  { %295 = dma.done.wait [#allocation4], 256  }
  0x3a   :  { %296 = vsyncadd [#allocation4], 4294967040 }
  0x3b   :  { %238 = vsyncpa [#allocation3], 1 }
  0x3c   :  { %239 = vsyncpa [#allocation4], 1 }

</bundles_post_ra>
